<compile_context>
chip_gen: v6e
topology: v6e:2x2x1
jax: 0.10.0
libtpu: 0.0.40
codegen_flags: <defaults>
</compile_context>

<pallas_src>
import functools

import jax
import jax.numpy as jnp
from jax.experimental import pallas as pl
from jax.experimental.pallas import tpu as pltpu


def _cdiv(a, b):
    return -(-a // b)


def _round_up(a, b):
    return _cdiv(a, b) * b


def _is_v7x():
    try:
        kind = jax.devices()[0].device_kind.lower()
        return "v7" in kind
    except Exception:
        return False


def _choose_tiling(nc, hw, itemsize, *, target_bytes, min_steps):
    """Pick (row_tile, lane_tile) for the (NC, HW) slab.

    row_tile: multiple of the dtype sublane tile (8/16/32) or the full NC extent.
    lane_tile: full HW, or a multiple of 128 when HW must be split (byte target
               exceeded, or the row grid would otherwise have < 2 steps).
    """
    sub = max(8, 32 // max(itemsize, 1))          # dtype-aware sublane multiple
    row_bytes = max(hw * itemsize, 1)

    tm = max(1, target_bytes // row_bytes)
    tm = max(sub, (tm // sub) * sub)
    if nc >= sub * min_steps:
        # keep ~min_steps row tiles (pipelining depth / megacore sharding)
        cap = _round_up(_cdiv(nc, min_steps), sub)
        tm = min(tm, max(sub, cap))
    if tm >= nc:
        tm = nc                                    # full extent is always legal
    n_row = _cdiv(nc, tm)

    tl = hw
    tile_bytes = tm * hw * itemsize
    lane_splits = max(_cdiv(tile_bytes, target_bytes), 2 if n_row < 2 else 1)
    if lane_splits > 1 and hw > 128:
        tl = max(128, _round_up(_cdiv(hw, lane_splits), 128))
        if tl >= hw:
            tl = hw
    return tm, tl


def _se_gate_kernel(x_ref, g_ref, o_ref, *, row_tile, row_align):
    # x_ref: (row_tile, lane_tile) feature tile
    # g_ref: (NC_pad, 1) resident pre-sigmoid gate column (fetched once)
    # o_ref: (row_tile, lane_tile) output tile
    r0 = pl.multiple_of(pl.program_id(0) * row_tile, row_align)
    g = g_ref[pl.ds(r0, row_tile), :]
    gate = jax.nn.sigmoid(g.astype(jnp.float32)).astype(x_ref.dtype)
    o_ref[...] = x_ref[...] * gate


def sigmoid_mul(x182, x178):
    """x182: (N, C, 1, 1) pre-sigmoid gate, x178: (N, C, H, W) features -> (N, C, H, W)."""
    N, C, H, W = x178.shape
    assert x182.shape == (N, C, 1, 1)
    NC, HW = N * C, H * W

    x2d = x178.reshape(NC, HW)           # lane axis = spatial
    g2d = x182.reshape(NC, 1)

    itemsize = jnp.dtype(x178.dtype).itemsize
    g_itemsize = jnp.dtype(x182.dtype).itemsize
    sub = max(8, 32 // max(itemsize, 1))

    target_bytes = 4 << 20               # ~4 MiB blocks (pure HBM streaming)
    min_steps = 2 if _is_v7x() else 4
    tm, tl = _choose_tiling(NC, HW, itemsize,
                            target_bytes=target_bytes, min_steps=min_steps)
    n_row = _cdiv(NC, tm)
    n_lane = _cdiv(HW, tl)

    # Resident gate: pad to n_row * tm rows so the in-kernel dynamic slice is
    # always in bounds (tiny array; extra rows are discarded with the padded
    # output rows of the last block).
    NC_pad = n_row * tm
    if NC_pad != NC:
        g2d = jnp.pad(g2d, ((0, NC_pad - NC), (0, 0)))

    # Truthful alignment hint for the slice start: tm is sublane-aligned unless
    # it equals the full NC extent (in which case n_row == 1 and the start is 0).
    row_align = sub if tm % sub == 0 else max(tm, 1)

    # Cover the double-buffered in+out footprint plus the resident gate, with
    # headroom; keeps big tiles legal on v5e's 16 MiB default scoped limit and
    # stays well under v7x's 64 MiB physical VMEM.
    tile_bytes = tm * tl * itemsize
    gate_bytes = NC_pad * g_itemsize
    vmem_limit = int(min(max(4 * tile_bytes + 2 * gate_bytes + (4 << 20),
                             24 << 20),
                         56 << 20))

    cost = pl.CostEstimate(
        flops=NC * HW,                   # one multiply per element
        transcendentals=NC,              # one sigmoid per channel
        bytes_accessed=2 * NC * HW * itemsize + NC * g_itemsize,
    )

    kernel = functools.partial(_se_gate_kernel, row_tile=tm, row_align=row_align)

    out2d = pl.pallas_call(
        kernel,
        out_shape=jax.ShapeDtypeStruct((NC, HW), x178.dtype),
        grid_spec=pl.GridSpec(
            grid=(n_row, n_lane),
            in_specs=[
                pl.BlockSpec((tm, tl), lambda i, j: (i, j)),
                pl.BlockSpec((NC_pad, 1), lambda i, j: (0, 0)),   # resident gate
            ],
            out_specs=pl.BlockSpec((tm, tl), lambda i, j: (i, j)),
        ),
        compiler_params=pltpu.CompilerParams(
            dimension_semantics=("parallel", "parallel"),
            vmem_limit_bytes=vmem_limit,
        ),
        cost_estimate=cost,
    )(x2d, g2d)

    return out2d.reshape(N, C, H, W)


if __name__ == "__main__":
    key = jax.random.PRNGKey(0)
    k1, k2, k3, k4, k5, k6 = jax.random.split(key, 6)

    # Small shapes consistent with the module's forward (NCHW features +
    # per-channel gate).  NC=8 < 2*sublane, so this exercises the degenerate
    # row grid -> 2-D (rows, lane-tiles) path.
    N, C, H, W = 2, 4, 16, 16
    x178 = jax.random.normal(k1, (N, C, H, W), dtype=jnp.float32)
    x182 = jax.random.normal(k2, (N, C, 1, 1), dtype=jnp.float32)

    out = jax.block_until_ready(sigmoid_mul(x182, x178))
    ref = x178 * jax.nn.sigmoid(x182)
    assert out.shape == (N, C, H, W)
    assert jnp.allclose(out, ref, atol=1e-6, rtol=1e-6)

    # Original module shape (1, 480, 28, 28): multi-step row-tiled path
    # (grid (4,1) on v5e/v6e, (2,1) on v7x).
    xb = jax.random.normal(k3, (1, 480, 28, 28), dtype=jnp.float32)
    gb = jax.random.normal(k4, (1, 480, 1, 1), dtype=jnp.float32)
    outb = jax.block_until_ready(sigmoid_mul(gb, xb))
    refb = xb * jax.nn.sigmoid(gb)
    assert jnp.allclose(outb, refb, atol=1e-6, rtol=1e-6)

    # bf16 path: exercises the dtype-aware (16-row) sublane alignment and the
    # padded resident gate.  Gate is sigmoided in f32 then cast to bf16 before
    # the multiply, so allow a couple of bf16 ulps vs the jnp reference.
    xc = jax.random.normal(k5, (1, 480, 28, 28), dtype=jnp.bfloat16)
    gc = jax.random.normal(k6, (1, 480, 1, 1), dtype=jnp.bfloat16)
    outc = jax.block_until_ready(sigmoid_mul(gc, xc))
    refc = xc * jax.nn.sigmoid(gc)
    assert jnp.allclose(outc.astype(jnp.float32), refc.astype(jnp.float32),
                        atol=0.1, rtol=0.05)

    print("KERNEL_OK")
</pallas_src>

<mosaic_0001>
module attributes {stable_mosaic.version = 11 : i64} {
  func.func @_se_gate_kernel(%arg0: i32, %arg1: i32, %arg2: memref<8x128xf32, #tpu.memory_space<vmem>>, %arg3: memref<8x1xf32, #tpu.memory_space<vmem>>, %arg4: memref<8x128xf32, #tpu.memory_space<vmem>>) attributes {dimension_semantics = [#tpu.dimension_semantics<parallel>, #tpu.dimension_semantics<parallel>], iteration_bounds = array<i64: 1, 2>, scalar_prefetch = 0 : i64, scratch_operands = 0 : i64, tpu.core_type = #tpu.core_type<tc>, window_params = [{transform_indices = @transform_0, window_bounds = array<i64: 8, 128>}, {pipeline_mode = #tpu.pipeline_mode<synchronous>, transform_indices = @transform_1, window_bounds = array<i64: 8, 1>}, {transform_indices = @transform_2, window_bounds = array<i64: 8, 128>}]} {
    %c8_i32 = arith.constant 8 : i32
    %0 = arith.muli %arg0, %c8_i32 : i32
    %1 = tpu.assume_multiple %0, 8 : i32
    %2 = arith.index_cast %1 : i32 to index
    %c0 = arith.constant 0 : index
    %3 = vector.load %arg3[%2, %c0] : memref<8x1xf32, #tpu.memory_space<vmem>>, vector<8x1xf32>
    %4 = arith.negf %3 : vector<8x1xf32>
    %5 = math.exp %4 : vector<8x1xf32>
    %cst = arith.constant 1.000000e+00 : f32
    %6 = vector.broadcast %cst : f32 to vector<8x1xf32>
    %7 = arith.addf %6, %5 : vector<8x1xf32>
    %8 = arith.divf %6, %7 : vector<8x1xf32>
    %c0_0 = arith.constant 0 : index
    %c0_1 = arith.constant 0 : index
    %9 = vector.load %arg2[%c0_0, %c0_1] : memref<8x128xf32, #tpu.memory_space<vmem>>, vector<8x128xf32>
    %10 = vector.broadcast %8 : vector<8x1xf32> to vector<8x128xf32>
    %11 = arith.mulf %9, %10 : vector<8x128xf32>
    %c0_2 = arith.constant 0 : index
    %c0_3 = arith.constant 0 : index
    %12 = vector.load %arg4[%c0_2, %c0_3] : memref<8x128xf32, #tpu.memory_space<vmem>>, vector<8x128xf32>
    tpu.vector_store %arg4[%c0_2, %c0_3], %11 {strides = array<i32>} : memref<8x128xf32, #tpu.memory_space<vmem>>, vector<8x128xf32>,
    return
  }
  func.func @transform_0(%arg0: i32, %arg1: i32) -> (i32, i32) {
    %c0_i32 = arith.constant 0 : i32
    return %arg0, %arg1 : i32, i32
  }
  func.func @transform_1(%arg0: i32, %arg1: i32) -> (i32, i32) {
    %c0_i32 = arith.constant 0 : i32
    %c0_i32_0 = arith.constant 0 : i32
    %c0_i32_1 = arith.constant 0 : i32
    return %c0_i32, %c0_i32_0 : i32, i32
  }
  func.func @transform_2(%arg0: i32, %arg1: i32) -> (i32, i32) {
    %c0_i32 = arith.constant 0 : i32
    return %arg0, %arg1 : i32, i32
  }
}

</mosaic_0001>

<bundles_post_ra>
// kernel: tpu_custom_call.1
= control target key start
LH: loop header
LB: loop body
LE: loop exit
PB: predicated region body
PF: predicated region fallthrough
CT: control target
= control target key end

     0   :  { %7 = vsyncpa [#allocation3], 0  ;;  %s641_s0 = inlined_call_operand.hbm [shape: f32[8,256], index: 0, kind: input, shape index: {}]   ;;  %s642_s1 = inlined_call_operand.vmem [shape: f32[8,1], index: 1, kind: input, shape index: {}]   ;;  %s643_s2 = inlined_call_operand.hbm [shape: f32[8,256], index: 2, kind: output, shape index: {}]  }
   0x1   :  { %9 = vsyncpa [#allocation3 + $0x1], 0 }
   0x2   :  { %10 = vsyncpa [#allocation4], 0 }
   0x3   :  { %12 = vsyncpa [#allocation4 + $0x1], 0  ;;  %s504_s9 = smov 0   ;;  %s506_s10 = smov 0  }
   0x4   :  { %s508_s11 = smov 0   ;;  %s510_s12 = smov 0  }
   0x5   :  { %s512_s13 = smov 0   ;;  %s514_s14 = smov 0  }
   0x6 LB: > { %s294_s15 = sadd.s32 4294967295, %s484_s14   ;;  %s295_s16 = sadd.s32 4294967294, %s484_s14   ;;  %s484_s14 = sphi %s514_s14, %s18_s14   ;;  %s480_s13 = sphi %s512_s13, %s655_s13   ;;  %s476_s12 = sphi %s510_s12, %s654_s12   ;;  %s472_s11 = sphi %s508_s11, %s653_s11   ;;  %s468_s10 = sphi %s506_s10, %s652_s10   ;;  %s464_s9 = sphi %s504_s9, %s651_s9  }
   0x7   : > { %s27_s17 = sadd.s32 1, %s480_s13  ;;  %s39_s18 = sadd.s32 1, %s472_s11 }
   0x8   : > { %p28_p0 = scmp.ge.s32.totalorder %s27_s17, 2  ;;  %p46_p1 = scmp.ne.s32.totalorder %s472_s11, %s468_s10 }
   0x9   : > { %p47_p2 = scmp.eq.s32.totalorder %s484_s14, 0  ;;  %p52_p3 = scmp.ne.s32.totalorder %s468_s10, %s464_s9 }
   0xa   : > { %s657_s17 = smov (%p28_p0, %s27_s17), 0  ;;  %p53_p5 = scmp.eq.s32.totalorder %s294_s15, 0 }
   0xb   : > { %p545_p4 = por %p47_p2, %p46_p1  ;;  %s35_s20 = ssub.s32 %s480_s13, %s657_s17 }
   0xc   : > { %p99_p6 = scmp.eq.s32.totalorder %s294_s15, 1  ;;  %p37_p7 = scmp.eq.s32.totalorder %s35_s20, 0 }
   0xd   : > { %p551_p8 = por %p53_p5, %p52_p3  ;;  %p105_p10 = scmp.eq.s32.totalorder %s295_s16, 1 }
   0xe   : > { %p555_p9 = por %p99_p6, %p46_p1  ;;  %p320_p13 = scmp.lt.s32.totalorder %s484_s14, 2 }
   0xf   : > { %s560_s23 = scalar_select %p37_p7, %s472_s11, %s39_s18  }
  0x10   : > { %p562_p11 = por %p105_p10, %p52_p3  ;;  %s128_s25 = sand.u32 1, %s472_s11  }
  0x11   : > { %s298_s26 = sshll.u32 %s128_s25, 3  ;;  %s299_s27 = sshll.u32 %s480_s13, 7 }
  0x12   : > { %s647_s24 = scalar_select %p562_p11, 1, 0 }
  0x13   : > { %s139_s30 = scalar_lea.hbm %s641_s0, %s299_s27  ;;  %s132_s3 = scalar_lea.vmem [#allocation2], %s298_s26 }
  0x14   : > { %s141_s4 = sshll.u32 %s132_s3, 4  ;;  %p575_p0 = pnand %p320_p13, %p545_p4  ;;  %s142_s4 = int_to_ptr.vmem [resolvable:$true] %s141_s4 }
  0x15   : > { %p300_p1 = scmp.ge.s32.totalorder %s484_s14, 1  ;;  %p146_p2 = scmp.lt.s32.totalorder %s484_s14, 3 }
  0x16   : > { %s129_s6 = scalar_lea.sflag [#allocation3], %s128_s25  ;;  %p378_p3 = pneg %p575_p0 }
  0x17   : > { %s389_s7 = scalar_lea.vmem %s142_s4, 128  ;;  %s486_s8 = smov [#allocation2]  }
  0x18   : > { %p390_p5 = scmp.ne.s32.totalorder %s142_s4, %s389_s7  ;;  %s394_s15 = sshll.u32 %s486_s8, 4  ;;  %s395_s15 = int_to_ptr.vmem [resolvable:$false] %s394_s15 }
  0x19   : > { %s396_s16 = scalar_lea.vmem %s395_s15, 256  ;;  %p397_p10 = scmp.lt.s32.totalorder %s142_s4, %s395_s15 }
  0x1a   : > { %p392_p6 = pnand %p390_p5, %p378_p3  ;;  %p398_p12 = scmp.lt.s32.totalorder %s396_s16, %s389_s7 }
  0x1c   : > { %p393_p7 = pneg %p392_p6  ;;  %p399_p4 = por %p398_p12, %p397_p10 }
  0x1e   : > { %p400_p13 = pnand %p399_p4, %p393_p7 }
  0x20   : > { %403 = shalt.err (!%p400_p13)
}
  0x21   : > { %315 = dma.hbm_to_vmem [thread:$0]  (!%p575_p0), %s139_s30, 128, %s142_s4, %s129_s6  }
  0x22   : > { %p147_p11 = pnand %p300_p1, %p146_p2 }
  0x23   : > { %s590_s18 = sand.u32 (!%p147_p11), 1, %s468_s10  }
  0x24   : > { %150 = sbr.rel (%p147_p11) target bundleno = 214 (0xd6), region = 28  ;;  %s301_s19 = sshll.u32 (!%p147_p11), %s590_s18, 3 }
  0x25   : > { %s153_s20 = scalar_lea.sflag (!%p147_p11), [#allocation3], %s590_s18  ;;  %s156_s25 = scalar_lea.vmem (!%p147_p11), [#allocation2], %s301_s19 }
  0x29   : > { %455 = dma.done.wait (%p551_p8), %s153_s20, 128  }
  0x2a   : > { %457 = vsyncadd (%p551_p8), %s153_s20, 4294967168  ;;  %v487_v0 = vmov 0   ;;  %v179_v1 = vld [vmem:[%s642_s1] sm:$0xff]  ;;  %s305_s28 = sshll.u32 %s476_s12, 7  ;;  %s176_s21 = scalar_lea.vmem [#allocation5], %s301_s19 }
  0x2b   : > { %371 = vset.pattern.permute.xlu0 %v487_v0  ;;  %v303_v2 = vmul.f32 -1.442695, %v179_v1  ;;  %v186_v6 = vld [vmem:[%s156_s25] sm:$0xff]  ;;  %s210_s29 = sshll.u32 %s176_s21, 4  ;;  %s208_s4 = scalar_lea.hbm %s643_s2, %s305_s28  ;;  %s211_s29 = int_to_ptr.vmem [resolvable:$true] %s210_s29 }
  0x2c   : > { %s195_s5 = scalar_lea.sflag [#allocation4], %s590_s18  ;;  %s404_s6 = scalar_lea.vmem %s211_s29, 128 }
  0x2d   : > { %372 = vpow2.f32 %v303_v2  ;;  %p405_p8 = scmp.ne.s32.totalorder %s211_s29, %s404_s6  ;;  %s488_s7 = smov [#allocation5]  }
  0x2e   : > { %s408_s8 = sshll.u32 %s488_s7, 4  ;;  %s409_s8 = int_to_ptr.vmem [resolvable:$false] %s408_s8 }
  0x2f   : > { %p406_p11 = pnand %p405_p8, %p555_p9  ;;  %s410_s12 = scalar_lea.vmem %s409_s8, 256 }
  0x30   : > { %p411_p0 = scmp.lt.s32.totalorder %s211_s29, %s409_s8  ;;  %p412_p1 = scmp.lt.s32.totalorder %s410_s12, %s404_s6 }
  0x31   : > { %p407_p12 = pneg %p406_p11 }
  0x32   : > { %p413_p2 = por %p412_p1, %p411_p0 }
  0x34   : > { %p414_p3 = pnand %p413_p2, %p407_p12 }
  0x3a   : > { %v373_v3 = vpop.eup %372 }
  0x3b   : > { %v183_v4 = vadd.f32 1.0, %v373_v3 }
  0x3d   : > { %374 = vrcp.f32 %v183_v4 }
  0x4a   : > { %v375_v5 = vpop.eup %374 }
  0x4b   : > { %189 = vperm.xlu0 %371, %v375_v5  }
  0xc6   : > { %v190_v7 = vpop.permute.xlu0 %189 }
  0xc7   : > { %v192_v8 = vmul.f32 %v190_v7, %v186_v6 }
  0xc9   : > { %193 = vst [vmem:[%s176_s21] sm:$0xff] %v192_v8 }
  0xca   : > { %417 = shalt.err (!%p414_p3)
}
  0xcb   : > { %s418_s15 = scalar_lea.hbm %s208_s4, 128  ;;  %s422_s19 = scalar_lea.hbm %s643_s2, 256 }
  0xcc   : > { %p419_p5 = scmp.ne.s32.totalorder %s208_s4, %s418_s15  ;;  %p423_p10 = scmp.lt.s32.totalorder %s208_s4, %s643_s2 }
  0xcd   : > { %p424_p4 = scmp.lt.s32.totalorder %s422_s19, %s418_s15 }
  0xce   : > { %p420_p6 = pnand %p419_p5, %p555_p9 }
  0xcf   : > { %p425_p13 = por %p424_p4, %p423_p10 }
  0xd0   : > { %p421_p7 = pneg %p420_p6 }
  0xd2   : > { %p426_p8 = pnand %p425_p13, %p421_p7 }
  0xd4   : > { %429 = shalt.err (!%p426_p8)
}
  0xd5   : > { %310 = dma.vmem_to_hbm [thread:$0]  (%p555_p9), %s211_s29, 128, %s208_s4, %s195_s5  }
  0xd6 PF: > { %s222_s26 = sand.u32 1, %s464_s9   ;;  %p649_p11 = scmp.ne.s32.totalorder %s647_s24, 0 }
  0xd7   : > { %p650_p12 = scmp.ge.s32.totalorder %s484_s14, 2  ;;  %s223_s27 = scalar_lea.sflag [#allocation4], %s222_s26 }
  0xd9   : > { %p317_p0 = pnand %p650_p12, %p649_p11 }
  0xdb   : > { %p318_p1 = pneg %p317_p0 }
  0xdd   : > { %459 = dma.done.wait (%p318_p1), %s223_s27, 128  }
  0xde   : > { %461 = vsyncadd (%p318_p1), %s223_s27, 4294967168  ;;  %s18_s14 = sadd.s32 1, %s484_s14   ;;  %s651_s9 = smov %s468_s10 }
  0xdf   : > { %p15_p2 = scmp.ge.s32.totalorder %s18_s14, 4   ;;  %s652_s10 = smov %s472_s11 }
  0xe0   : > { %s653_s11 = smov %s560_s23  ;;  %s654_s12 = smov %s480_s13 }
  0xe1   : > { %s655_s13 = smov %s657_s17  ;;  %17 = sbr.rel (!%p15_p2) target bundleno = 6 (0x6), region = 74 }
  0xe6   :  { %228 = vsyncpa [#allocation3], 1 }
  0xe7   :  { %230 = vsyncpa [#allocation3 + $0x1], 1 }
  0xe8   :  { %231 = vsyncpa [#allocation4], 1 }
  0xe9   :  { %233 = vsyncpa [#allocation4 + $0x1], 1 }

</bundles_post_ra>
